<compile_context>
chip_gen: v7x
topology: tpu7x:2x2x1
jax: 0.10.0
libtpu: 0.0.40
codegen_flags: <defaults>
</compile_context>

<pallas_src>
import functools

import jax
import jax.numpy as jnp
from jax.experimental import pallas as pl
from jax.experimental.pallas import tpu as pltpu

# PyTorch module widths and their lane-dense padded versions.
H1 = 100
H2 = 150
H1_PAD = 128    # 100 padded to one lane-width
H2_PAD = 256    # 150 padded to two lane-widths


def _round_up(n, m):
    return ((n + m - 1) // m) * m


def _cdiv(a, b):
    return -(-a // b)


def mlp_kernel(x_ref, w1_ref, b1_ref, w2_ref, b2_ref, w3_ref, b3_ref, o_ref):
    # layer_1 + ReLU (padded weight cols / bias entries are zero -> ReLU(0)=0)
    h1 = jnp.dot(x_ref[...], w1_ref[...], preferred_element_type=jnp.float32)
    h1 = jnp.maximum(h1 + b1_ref[...], 0.0)
    # layer_2 + ReLU
    h2 = jnp.dot(h1, w2_ref[...], preferred_element_type=jnp.float32)
    h2 = jnp.maximum(h2 + b2_ref[...], 0.0)
    # layer_out: output width is 1, so skip the MXU entirely.  Broadcast-mul
    # (tm, 256) by the (1, 256) weight row on the VPU and lane-reduce on the
    # XLU.  Padded h2 columns are exactly zero, so the reduction is exact.
    out = jnp.sum(h2 * w3_ref[...], axis=-1, keepdims=True)
    o_ref[...] = (out + b3_ref[...]).astype(o_ref.dtype)


def pad_params(params):
    """Zero-pad weights/biases once (outside the kernel) to lane-dense shapes."""
    f = params["w1"].shape[0]
    w1 = jnp.zeros((f, H1_PAD), jnp.float32).at[:, :H1].set(params["w1"])
    b1 = jnp.zeros((1, H1_PAD), jnp.float32).at[:, :H1].set(params["b1"])
    w2 = jnp.zeros((H1_PAD, H2_PAD), jnp.float32).at[:H1, :H2].set(params["w2"])
    b2 = jnp.zeros((1, H2_PAD), jnp.float32).at[:, :H2].set(params["b2"])
    # layer_out weight stored as a single (1, H2_PAD) row for the VPU/XLU dot.
    w3 = jnp.zeros((1, H2_PAD), jnp.float32).at[:, :H2].set(params["w3"][:, 0][None, :])
    b3 = params["b3"].reshape(1, 1).astype(jnp.float32)
    return {"w1": w1, "b1": b1, "w2": w2, "b2": b2, "w3": w3, "b3": b3}


def _choose_tiling(batch, block_m):
    """Pick a batch tile that (a) is a multiple of 8, (b) divides the padded
    batch tightly (no ~2x over-padding), and (c) leaves >= 2 grid steps when
    possible so v7x's two TensorCores both get work."""
    b8 = _round_up(max(batch, 8), 8)
    min_steps = 2 if b8 >= 16 else 1
    steps = max(_cdiv(b8, block_m), min_steps)
    tm = _round_up(_cdiv(b8, steps), 8)
    steps = _cdiv(b8, tm)
    b_pad = tm * steps
    return tm, steps, b_pad


@functools.partial(jax.jit, static_argnames=("block_m",))
def multiple_regression_forward(x, pp, block_m=2048):
    """Forward pass of MultipleRegression.

    x:  (B, num_features) float32
    pp: padded params from pad_params()
    returns: (B, 1) float32

    block_m=2048 keeps per-step VMEM (~tm*(F+128+256+1)*4 B plus ~136 KiB of
    resident weights) well under the 32 MiB scoped limit on every generation,
    including v7x's 64 MiB/TC physical VMEM.
    """
    B, F = x.shape
    tm, steps, b_pad = _choose_tiling(B, block_m)
    if b_pad != B:
        # Only a few rows of padding (< 8 per grid step), not round_up(B, tm).
        x = jnp.pad(x, ((0, b_pad - B), (0, 0)))
    grid = (steps,)

    flops = 2 * b_pad * (F * H1_PAD + H1_PAD * H2_PAD + H2_PAD)
    bytes_accessed = 4 * (
        b_pad * F + b_pad * 1                      # activations in / out
        + F * H1_PAD + H1_PAD                      # layer 1 weights + bias
        + H1_PAD * H2_PAD + H2_PAD                 # layer 2
        + H2_PAD + 1                               # layer out (row) + bias
    )

    out = pl.pallas_call(
        mlp_kernel,
        out_shape=jax.ShapeDtypeStruct((b_pad, 1), jnp.float32),
        grid=grid,
        in_specs=[
            # x is tiled over the batch axis (double-buffered by Pallas).
            pl.BlockSpec((tm, F), lambda i: (i, 0)),
            # Weights/biases: same block every step -> stay resident in VMEM.
            pl.BlockSpec((F, H1_PAD), lambda i: (0, 0)),
            pl.BlockSpec((1, H1_PAD), lambda i: (0, 0)),
            pl.BlockSpec((H1_PAD, H2_PAD), lambda i: (0, 0)),
            pl.BlockSpec((1, H2_PAD), lambda i: (0, 0)),
            pl.BlockSpec((1, H2_PAD), lambda i: (0, 0)),
            pl.BlockSpec((1, 1), lambda i: (0, 0)),
        ],
        out_specs=pl.BlockSpec((tm, 1), lambda i: (i, 0)),
        compiler_params=pltpu.CompilerParams(
            # Batch tiles are independent: lets v7x shard them over its 2 TCs.
            dimension_semantics=("parallel",),
            vmem_limit_bytes=32 << 20,
        ),
        cost_estimate=pl.CostEstimate(
            flops=flops, transcendentals=0, bytes_accessed=bytes_accessed),
    )(x, pp["w1"], pp["b1"], pp["w2"], pp["b2"], pp["w3"], pp["b3"])

    # Only the first B rows are real output (tiny slice on a (b_pad, 1) array).
    return out[:B] if b_pad != B else out


def init_params(num_features, key):
    """Deterministic init matching the PyTorch module's shapes.

    PyTorch nn.Linear(in, out) has weight (out, in); we store the transpose
    (in, out) so the kernel does x @ W + b directly.
    """
    ks = jax.random.split(key, 6)

    def uniform(k, shape, fan_in):
        bound = 1.0 / jnp.sqrt(fan_in)
        return jax.random.uniform(k, shape, jnp.float32, -bound, bound)

    return {
        "w1": uniform(ks[0], (num_features, H1), num_features),
        "b1": uniform(ks[1], (1, H1), num_features),
        "w2": uniform(ks[2], (H1, H2), H1),
        "b2": uniform(ks[3], (1, H2), H1),
        "w3": uniform(ks[4], (H2, 1), H2),
        "b3": uniform(ks[5], (1, 1), H2),
    }


if __name__ == "__main__":
    key = jax.random.PRNGKey(0)
    k_x, k_p = jax.random.split(key)

    num_features = 8
    params = init_params(num_features, k_p)
    padded_params = pad_params(params)

    def ref_forward(xx):
        h1 = jnp.maximum(xx @ params["w1"] + params["b1"], 0.0)
        h2 = jnp.maximum(h1 @ params["w2"] + params["b2"], 0.0)
        return h2 @ params["w3"] + params["b3"]

    # batch=8: single grid step.  batch=24: exercises batch padding (24->32)
    # and a 2-step parallel grid (the v7x megacore path).
    for batch in (8, 24):
        x = jax.random.normal(jax.random.fold_in(k_x, batch),
                              (batch, num_features), dtype=jnp.float32)
        out = jax.block_until_ready(
            multiple_regression_forward(x, padded_params))
        ref = ref_forward(x)
        assert out.shape == (batch, 1), out.shape
        assert jnp.allclose(out, ref, atol=1e-5, rtol=1e-5)

    print("KERNEL_OK")
</pallas_src>

<mosaic_0001>
module attributes {stable_mosaic.version = 11 : i64} {
  func.func @mlp_kernel(%arg0: i32, %arg1: memref<8x8xf32, #tpu.memory_space<vmem>>, %arg2: memref<8x128xf32, #tpu.memory_space<vmem>>, %arg3: memref<1x128xf32, #tpu.memory_space<vmem>>, %arg4: memref<128x256xf32, #tpu.memory_space<vmem>>, %arg5: memref<1x256xf32, #tpu.memory_space<vmem>>, %arg6: memref<1x256xf32, #tpu.memory_space<vmem>>, %arg7: memref<1x1xf32, #tpu.memory_space<vmem>>, %arg8: memref<8x1xf32, #tpu.memory_space<vmem>>) attributes {dimension_semantics = [#tpu.dimension_semantics<parallel>], iteration_bounds = array<i64: 1>, scalar_prefetch = 0 : i64, scratch_operands = 0 : i64, tpu.core_type = #tpu.core_type<tc>, window_params = [{transform_indices = @transform_0, window_bounds = array<i64: 8, 8>}, {pipeline_mode = #tpu.pipeline_mode<synchronous>, transform_indices = @transform_1, window_bounds = array<i64: 8, 128>}, {pipeline_mode = #tpu.pipeline_mode<synchronous>, transform_indices = @transform_2, window_bounds = array<i64: 1, 128>}, {pipeline_mode = #tpu.pipeline_mode<synchronous>, transform_indices = @transform_3, window_bounds = array<i64: 128, 256>}, {pipeline_mode = #tpu.pipeline_mode<synchronous>, transform_indices = @transform_4, window_bounds = array<i64: 1, 256>}, {pipeline_mode = #tpu.pipeline_mode<synchronous>, transform_indices = @transform_5, window_bounds = array<i64: 1, 256>}, {pipeline_mode = #tpu.pipeline_mode<synchronous>, transform_indices = @transform_6, window_bounds = array<i64: 1, 1>}, {transform_indices = @transform_7, window_bounds = array<i64: 8, 1>}]} {
    %c0 = arith.constant 0 : index
    %c0_0 = arith.constant 0 : index
    %0 = vector.load %arg1[%c0, %c0_0] : memref<8x8xf32, #tpu.memory_space<vmem>>, vector<8x8xf32>
    %c0_1 = arith.constant 0 : index
    %c0_2 = arith.constant 0 : index
    %1 = vector.load %arg2[%c0_1, %c0_2] : memref<8x128xf32, #tpu.memory_space<vmem>>, vector<8x128xf32>
    %cst = arith.constant dense<0.000000e+00> : vector<8x128xf32>
    %2 = tpu.matmul %0, %1, %cst {dimension_numbers = #tpu.dot_dimension_numbers<[1], [0], [0], [1], [0, 0, 1, 1], [], []>} : vector<8x8xf32>, vector<8x128xf32>, vector<8x128xf32> -> vector<8x128xf32>
    %c0_3 = arith.constant 0 : index
    %c0_4 = arith.constant 0 : index
    %3 = vector.load %arg3[%c0_3, %c0_4] : memref<1x128xf32, #tpu.memory_space<vmem>>, vector<1x128xf32>
    %4 = vector.broadcast %3 : vector<1x128xf32> to vector<8x128xf32>
    %5 = arith.addf %2, %4 : vector<8x128xf32>
    %cst_5 = arith.constant 0.000000e+00 : f32
    %6 = vector.broadcast %cst_5 : f32 to vector<8x128xf32>
    %7 = arith.maximumf %5, %6 : vector<8x128xf32>
    %c0_6 = arith.constant 0 : index
    %c0_7 = arith.constant 0 : index
    %8 = vector.load %arg4[%c0_6, %c0_7] : memref<128x256xf32, #tpu.memory_space<vmem>>, vector<128x256xf32>
    %cst_8 = arith.constant dense<0.000000e+00> : vector<8x256xf32>
    %9 = tpu.matmul %7, %8, %cst_8 {dimension_numbers = #tpu.dot_dimension_numbers<[1], [0], [0], [1], [0, 0, 1, 1], [], []>} : vector<8x128xf32>, vector<128x256xf32>, vector<8x256xf32> -> vector<8x256xf32>
    %c0_9 = arith.constant 0 : index
    %c0_10 = arith.constant 0 : index
    %10 = vector.load %arg5[%c0_9, %c0_10] : memref<1x256xf32, #tpu.memory_space<vmem>>, vector<1x256xf32>
    %11 = vector.broadcast %10 : vector<1x256xf32> to vector<8x256xf32>
    %12 = arith.addf %9, %11 : vector<8x256xf32>
    %cst_11 = arith.constant 0.000000e+00 : f32
    %13 = vector.broadcast %cst_11 : f32 to vector<8x256xf32>
    %14 = arith.maximumf %12, %13 : vector<8x256xf32>
    %c0_12 = arith.constant 0 : index
    %c0_13 = arith.constant 0 : index
    %15 = vector.load %arg6[%c0_12, %c0_13] : memref<1x256xf32, #tpu.memory_space<vmem>>, vector<1x256xf32>
    %16 = vector.broadcast %15 : vector<1x256xf32> to vector<8x256xf32>
    %17 = arith.mulf %14, %16 : vector<8x256xf32>
    %cst_14 = arith.constant dense<0.000000e+00> : vector<8xf32>
    %18 = vector.multi_reduction <add>, %17, %cst_14 [1] : vector<8x256xf32> to vector<8xf32>
    %19 = vector.shape_cast %18 : vector<8xf32> to vector<8x1xf32>
    %c0_15 = arith.constant 0 : index
    %c0_16 = arith.constant 0 : index
    %20 = vector.load %arg7[%c0_15, %c0_16] : memref<1x1xf32, #tpu.memory_space<vmem>>, vector<1x1xf32>
    %21 = vector.broadcast %20 : vector<1x1xf32> to vector<8x1xf32>
    %22 = arith.addf %19, %21 : vector<8x1xf32>
    %c0_17 = arith.constant 0 : index
    %c0_18 = arith.constant 0 : index
    %23 = vector.load %arg8[%c0_17, %c0_18] : memref<8x1xf32, #tpu.memory_space<vmem>>, vector<8x1xf32>
    tpu.vector_store %arg8[%c0_17, %c0_18], %22 {strides = array<i32>} : memref<8x1xf32, #tpu.memory_space<vmem>>, vector<8x1xf32>,
    return
  }
  func.func @transform_0(%arg0: i32) -> (i32, i32) {
    %c0_i32 = arith.constant 0 : i32
    %c0_i32_0 = arith.constant 0 : i32
    return %arg0, %c0_i32 : i32, i32
  }
  func.func @transform_1(%arg0: i32) -> (i32, i32) {
    %c0_i32 = arith.constant 0 : i32
    %c0_i32_0 = arith.constant 0 : i32
    %c0_i32_1 = arith.constant 0 : i32
    return %c0_i32, %c0_i32_0 : i32, i32
  }
  func.func @transform_2(%arg0: i32) -> (i32, i32) {
    %c0_i32 = arith.constant 0 : i32
    %c0_i32_0 = arith.constant 0 : i32
    %c0_i32_1 = arith.constant 0 : i32
    return %c0_i32, %c0_i32_0 : i32, i32
  }
  func.func @transform_3(%arg0: i32) -> (i32, i32) {
    %c0_i32 = arith.constant 0 : i32
    %c0_i32_0 = arith.constant 0 : i32
    %c0_i32_1 = arith.constant 0 : i32
    return %c0_i32, %c0_i32_0 : i32, i32
  }
  func.func @transform_4(%arg0: i32) -> (i32, i32) {
    %c0_i32 = arith.constant 0 : i32
    %c0_i32_0 = arith.constant 0 : i32
    %c0_i32_1 = arith.constant 0 : i32
    return %c0_i32, %c0_i32_0 : i32, i32
  }
  func.func @transform_5(%arg0: i32) -> (i32, i32) {
    %c0_i32 = arith.constant 0 : i32
    %c0_i32_0 = arith.constant 0 : i32
    %c0_i32_1 = arith.constant 0 : i32
    return %c0_i32, %c0_i32_0 : i32, i32
  }
  func.func @transform_6(%arg0: i32) -> (i32, i32) {
    %c0_i32 = arith.constant 0 : i32
    %c0_i32_0 = arith.constant 0 : i32
    %c0_i32_1 = arith.constant 0 : i32
    return %c0_i32, %c0_i32_0 : i32, i32
  }
  func.func @transform_7(%arg0: i32) -> (i32, i32) {
    %c0_i32 = arith.constant 0 : i32
    %c0_i32_0 = arith.constant 0 : i32
    return %arg0, %c0_i32 : i32, i32
  }
}

</mosaic_0001>

<bundles_post_ra>
// kernel: multiple_regression_forward.1
= control target key start
LH: loop header
LB: loop body
LE: loop exit
PB: predicated region body
PF: predicated region fallthrough
CT: control target
= control target key end

     0   :  { %s479_s0 = inlined_call_operand.hbm [shape: f32[8,8], index: 0, kind: input, shape index: {}]   ;;  %s480_s1 = inlined_call_operand.vmem [shape: f32[8,128], index: 1, kind: input, shape index: {}]   ;;  %s481_s2 = inlined_call_operand.vmem [shape: f32[1,128], index: 2, kind: input, shape index: {}]   ;;  %s482_s3 = inlined_call_operand.hbm [shape: f32[128,256], index: 3, kind: input, shape index: {}]   ;;  %s483_s4 = inlined_call_operand.vmem [shape: f32[1,256], index: 4, kind: input, shape index: {}]   ;;  %s484_s5 = inlined_call_operand.vmem [shape: f32[1,256], index: 5, kind: input, shape index: {}]   ;;  %s485_s6 = inlined_call_operand.<no memory space> [shape: f32[1,1], index: 6, kind: input, shape index: {}]   ;;  %s486_s7 = inlined_call_operand.vmem [shape: f32[8,1], index: 7, kind: output, shape index: {}]  }
   0x1   :  { %v12_v0 = vstv %s485_s6 }
   0x2   :  { %13 = vst [vmem:[#allocation2] sm:$0x1] %v12_v0 }
   0x3   :  { %14 = vsyncpa [#allocation4], 0 }
   0x4   :  { %15 = vsyncpa [#allocation6], 0  ;;  %s384_s26 = smov [#allocation3]   ;;  %s385_s28 = smov [#allocation5]  }
   0x5   :  { %s22_s27 = sshll.u32 %s384_s26, 4  ;;  %s35_s29 = sshll.u32 %s385_s28, 4  ;;  %s23_s27 = int_to_ptr.vmem [resolvable:$true] %s22_s27  ;;  %s433_s29 = int_to_ptr.vmem [resolvable:$true] %s35_s29 }
   0x6   :  { %s336_s9 = scalar_lea.hbm %s479_s0, 128 }
   0x7   :  { %p337_p0 = scmp.ne.s32.totalorder %s479_s0, %s336_s9  ;;  %p340_p1 = scmp.lt.u32.totalorder %s336_s9, %s479_s0 }
   0x9   :  { %p342_p2 = pnand %p340_p1, %p337_p0 }
   0xb   :  { %345 = shalt.err (!%p342_p2)
}
   0xc   :  { %s346_s13 = scalar_lea.vmem %s23_s27, 128  ;;  %p351_p4 = scmp.lt.s32.totalorder %s23_s27, %s23_s27 }
   0xd   :  { %p347_p3 = scmp.ne.s32.totalorder %s23_s27, %s346_s13  ;;  %p352_p5 = scmp.lt.s32.totalorder %s346_s13, %s346_s13 }
   0xf   :  { %p353_p6 = por %p352_p5, %p351_p4 }
  0x11   :  { %p354_p7 = pnand %p353_p6, %p347_p3 }
  0x13   :  { %357 = shalt.err (!%p354_p7)
}
  0x14   :  { %25 = dma.hbm_to_vmem [thread:$0]  %s479_s0, 128, %s23_s27, [#allocation4]  }
  0x15   :  { %s358_s18 = scalar_lea.hbm %s482_s3, 4096 }
  0x16   :  { %p359_p8 = scmp.ne.s32.totalorder %s482_s3, %s358_s18  ;;  %p362_p9 = scmp.lt.u32.totalorder %s358_s18, %s482_s3 }
  0x18   :  { %p364_p10 = pnand %p362_p9, %p359_p8 }
  0x1a   :  { %367 = shalt.err (!%p364_p10)
}
  0x1b   :  { %s368_s23 = scalar_lea.vmem %s433_s29, 4096  ;;  %p373_p12 = scmp.lt.s32.totalorder %s433_s29, %s433_s29 }
  0x1c   :  { %p369_p11 = scmp.ne.s32.totalorder %s433_s29, %s368_s23  ;;  %p374_p13 = scmp.lt.s32.totalorder %s368_s23, %s368_s23 }
  0x1e   :  { %p375_p0 = por %p374_p13, %p373_p12 }
  0x20   :  { %p376_p1 = pnand %p375_p0, %p369_p11 }
  0x22   :  { %379 = shalt.err (!%p376_p1)
}
  0x23   :  { %s386_s0 = smov 256   ;;  %s387_s24 = smov 16  }
  0x24   :  { %41 = dma.hbm_to_vmem [thread:$0]  %s482_s3, 4096, %s433_s29, [#allocation6], %s386_s0, %s386_s0, %s387_s24  }
  0x25   :  { %380 = dma.done.wait [#allocation4], 128  }
  0x26   :  { %381 = vsyncadd [#allocation4], 4294967168 }
  0x27   :  { %382 = dma.done.wait [#allocation6], 4096  }
  0x28   :  { %383 = vsyncadd [#allocation6], 4294963200  ;;  %v388_v1 = vmov 0.0   ;;  %vm389_vm0 = vmmov 0   ;;  %vm63_vm1 = vcmask 64512   ;;  %v55_v2 = vld [vmem:[%s480_s1] sm:$0xff]  ;;  %v172_v57 = vlaneseq }
  0x29   :  { %293 = vmatprep.subr.mxu0 %v388_v1  ;;  %295 = vmatprep.mubr.msk.f32.mxu0 %vm389_vm0, %v388_v1  ;;  %v54_v3 = vld [vmem:[#allocation3] sm:$0xff]  ;;  %v139_v4 = vld [vmem:[#allocation5 + $0x8] sm:$0xff]  ;;  %v138_v6 = vld [vmem:[#allocation5] sm:$0xff]  ;;  %vm280_vm2 = vcmask 7168  }
  0x2a   :  { %246 = vmatprep.mubr.f32.mxu1 %v388_v1  ;;  %294 = vmatpush3.msra.mxu0 %v55_v2  ;;  %v141_v5 = vld [vmem:[#allocation5 + $0x18] sm:$0xff]  ;;  %v140_v7 = vld [vmem:[#allocation5 + $0x10] sm:$0xff]  ;;  %v143_v10 = vld [vmem:[#allocation5 + $0x28] sm:$0xff]  ;;  %v173_v58 = vshrl.u32 %v172_v57, 7 }
  0x2b   :  { %296 = vmatmul.mubr.msk.f32.vlgmr.msra.gmra.mrb[0].mxu0 %vm63_vm1, %v54_v3  ;;  %v298_v8 = vpack.c.bf16 %v141_v5, %v139_v4  ;;  %v300_v9 = vpack.c.bf16 %v140_v7, %v138_v6  ;;  %v145_v11 = vld [vmem:[#allocation5 + $0x38] sm:$0xff]  ;;  %v142_v12 = vld [vmem:[#allocation5 + $0x20] sm:$0xff]  ;;  %v144_v14 = vld [vmem:[#allocation5 + $0x30] sm:$0xff] }
  0x2c   :  { %v302_v13 = vpack.c.bf16 %v145_v11, %v143_v10  ;;  %v147_v15 = vld [vmem:[#allocation5 + $0x48] sm:$0xff]  ;;  %v149_v16 = vld [vmem:[#allocation5 + $0x58] sm:$0xff]  ;;  %v304_v17 = vpack.c.bf16 %v144_v14, %v142_v12  ;;  %v146_v19 = vld [vmem:[#allocation5 + $0x40] sm:$0xff]  ;;  %v174_v59 = vsub.s32 0, %v173_v58  ;;  %v178_v61 = vsub.s32 1, %v173_v58 }
  0x2d   :  { %299 = vmatprep.subr.bf16.mxu1 %v298_v8  ;;  %v306_v18 = vpack.c.bf16 %v149_v16, %v147_v15  ;;  %v148_v20 = vld [vmem:[#allocation5 + $0x50] sm:$0xff]  ;;  %v151_v21 = vld [vmem:[#allocation5 + $0x68] sm:$0xff]  ;;  %v153_v22 = vld [vmem:[#allocation5 + $0x78] sm:$0xff] }
  0x2e   :  { %301 = vmatpush1.bf16.msra.mxu1 %v300_v9  ;;  %v308_v23 = vpack.c.bf16 %v148_v20, %v146_v19  ;;  %v310_v24 = vpack.c.bf16 %v153_v22, %v151_v21  ;;  %v150_v25 = vld [vmem:[#allocation5 + $0x60] sm:$0xff]  ;;  %v152_v26 = vld [vmem:[#allocation5 + $0x70] sm:$0xff]  ;;  %v155_v27 = vld [vmem:[#allocation5 + $0x88] sm:$0xff] }
  0x2f   :  { %303 = vmatprep.subr.bf16.mxu1 %v302_v13  ;;  %v157_v28 = vld [vmem:[#allocation5 + $0x98] sm:$0xff]  ;;  %v312_v29 = vpack.c.bf16 %v152_v26, %v150_v25  ;;  %v154_v31 = vld [vmem:[#allocation5 + $0x80] sm:$0xff]  ;;  %v156_v32 = vld [vmem:[#allocation5 + $0x90] sm:$0xff] }
  0x30   :  { %v314_v30 = vpack.c.bf16 %v157_v28, %v155_v27  ;;  %v159_v33 = vld [vmem:[#allocation5 + $0xa8] sm:$0xff]  ;;  %v161_v34 = vld [vmem:[#allocation5 + $0xb8] sm:$0xff]  ;;  %v316_v35 = vpack.c.bf16 %v156_v32, %v154_v31  ;;  %v158_v37 = vld [vmem:[#allocation5 + $0xa0] sm:$0xff] }
  0x31   :  { %v318_v36 = vpack.c.bf16 %v161_v34, %v159_v33  ;;  %v160_v38 = vld [vmem:[#allocation5 + $0xb0] sm:$0xff]  ;;  %v163_v39 = vld [vmem:[#allocation5 + $0xc8] sm:$0xff]  ;;  %v165_v40 = vld [vmem:[#allocation5 + $0xd8] sm:$0xff] }
  0x32   :  { %305 = vmatpush1.bf16.msra.mxu1 %v304_v17  ;;  %v320_v41 = vpack.c.bf16 %v160_v38, %v158_v37  ;;  %v322_v42 = vpack.c.bf16 %v165_v40, %v163_v39  ;;  %v162_v43 = vld [vmem:[#allocation5 + $0xc0] sm:$0xff]  ;;  %v164_v44 = vld [vmem:[#allocation5 + $0xd0] sm:$0xff]  ;;  %v167_v46 = vld [vmem:[#allocation5 + $0xe8] sm:$0xff] }
  0x33   :  { %307 = vmatprep.subr.bf16.mxu1 %v306_v18  ;;  %v324_v45 = vpack.c.bf16 %v164_v44, %v162_v43  ;;  %v169_v47 = vld [vmem:[#allocation5 + $0xf8] sm:$0xff]  ;;  %v166_v49 = vld [vmem:[#allocation5 + $0xe0] sm:$0xff]  ;;  %v168_v50 = vld [vmem:[#allocation5 + $0xf0] sm:$0xff] }
  0x34   :  { %v326_v48 = vpack.c.bf16 %v169_v47, %v167_v46  ;;  %v328_v51 = vpack.c.bf16 %v168_v50, %v166_v49  ;;  %v288_v52 = vld [vmem:[%s481_s2] ss:$0 sm:$0xff] }
  0x35   :  { %v170_v60 = vld [vmem:[%s483_s4] sm:$0x3] }
  0x36   :  { %309 = vmatpush1.bf16.msra.mxu1 %v308_v23  ;;  %v175_v62 = vrot.slane %v170_v60, %v174_v59  ;;  %v179_v63 = vrot.slane %v170_v60, %v178_v61  ;;  %v255_v0 = vld [vmem:[%s484_s5] sm:$0x3] }
  0x37   :  { %311 = vmatprep.subr.bf16.mxu1 %v310_v24  ;;  %v260_v4 = vrot.slane %v255_v0, %v174_v59  ;;  %v264_v6 = vrot.slane %v255_v0, %v178_v61  ;;  %v290_v12 = vld [vmem:[#allocation2] ss:$0 sm:$0xff] }
  0x3a   :  { %313 = vmatpush1.bf16.msra.mxu1 %v312_v29 }
  0x3b   :  { %315 = vmatprep.subr.bf16.mxu1 %v314_v30 }
  0x3e   :  { %317 = vmatpush1.bf16.msra.mxu1 %v316_v35 }
  0x3f   :  { %319 = vmatprep.subr.bf16.mxu1 %v318_v36 }
  0x42   :  { %321 = vmatpush1.bf16.msra.mxu1 %v320_v41 }
  0x43   :  { %323 = vmatprep.subr.bf16.mxu1 %v322_v42 }
  0x46   :  { %325 = vmatpush1.bf16.msra.mxu1 %v324_v45 }
  0x47   :  { %327 = vmatprep.subr.bf16.mxu1 %v326_v48 }
  0x4a   :  { %329 = vmatpush1.bf16.msra.mxu1 %v328_v51 }
  0xfe   :  { %v133_v53 = vpop.f32.mrb[0].mxu0 }
  0xff   :  { %v134_v54 = vadd.f32 %v288_v52, %v133_v53  ;;  %v297_v55 = vpop.f32.mrb[1].mxu0 }
 0x101   :  { %v137_v56 = vmax.f32 %v134_v54, 0.0 }
 0x103   :  { %247 = vmatmul.mubr.f32.vlgmr.msra.gmra.mrb[0].mxu1 %v137_v56 }
 0x1d6   :  { %v248_v1 = vpop.f32.mrb[0].mxu1 }
 0x1d7   :  { %v249_v2 = vadd.f32 %v248_v1, %v175_v62  ;;  %v250_v3 = vpop.f32.mrb[1].mxu1 }
 0x1d8   :  { %v251_v5 = vadd.f32 %v250_v3, %v179_v63 }
 0x1d9   :  { %v253_v7 = vmax.f32 %v249_v2, 0.0 }
 0x1da   :  { %v254_v8 = vmax.f32 %v251_v5, 0.0 }
 0x1db   :  { %v267_v9 = vmul.f32 %v260_v4, %v253_v7 }
 0x1dc   :  { %v268_v10 = vmul.f32 %v264_v6, %v254_v8 }
 0x1de   :  { %v269_v11 = vadd.f32 %v268_v10, %v267_v9 }
 0x1e0   :  { %270 = vadd.xlane.f32.xlu0 %v269_v11 }
 0x26d   :  { %v271_v13 = vpop.xlane.xlu0 %270 }
 0x26e   :  { %v279_v14 = vadd.f32 %v290_v12, %v271_v13 }
 0x270   :  { %281 = vst.msk [vmem:[%s486_s7] sm:$0xff] %vm280_vm2, %v279_v14 }
 0x271   :  { %286 = vsyncpa [#allocation4], 1 }
 0x272   :  { %287 = vsyncpa [#allocation6], 1 }

</bundles_post_ra>
